<compile_context>
chip_gen: v6e
topology: v6e:2x2x1
jax: 0.10.0
libtpu: 0.0.40
codegen_flags: <defaults>
</compile_context>

<pallas_src>
import jax
import jax.numpy as jnp
from jax import lax
from jax.experimental import pallas as pl
from jax.experimental.pallas import tpu as pltpu


def _sdpa_kernel(q_ref, k_ref, v_ref, m_ref, attn_ref, out_ref):
    # All refs are full arrays resident in VMEM (no grid):
    #   q_ref/k_ref/v_ref : (BH, S, D) float32
    #   m_ref             : (BH, S, S) bool
    #   attn_ref          : (BH, S, S) float32
    #   out_ref           : (BH, S, D) float32
    q = q_ref[...]
    k = k_ref[...]
    v = v_ref[...]
    m = m_ref[...].astype(q.dtype)          # bool -> f32 inside the kernel (VPU)

    # scores = q @ k^T, batched over heads; contract on the last dim of BOTH
    # operands so no transpose of k is materialized.  (BH, S, S), f32 acc.
    s = lax.dot_general(
        q, k,
        dimension_numbers=(((2,), (2,)), ((0,), (0,))),
        preferred_element_type=jnp.float32,
    )

    # numerically stable softmax along the last axis
    s_max = jnp.max(s, axis=-1, keepdims=True)
    p = jnp.exp(s - s_max)
    denom = jnp.sum(p, axis=-1, keepdims=True)
    # approx=False kept on purpose: approx vrcp (~1e-4 rel err) would violate
    # the 1e-5 attn_weight tolerance.
    attn = p * pl.reciprocal(denom, approx=False)

    # attn_weight *= attn_mask
    attn = attn * m

    # output = attn_weight @ v (batched over heads), then output *= attn_mask
    out = lax.dot_general(
        attn, v,
        dimension_numbers=(((2,), (1,)), ((0,), (0,))),
        preferred_element_type=jnp.float32,
    )
    out = out * m

    attn_ref[...] = attn.astype(attn_ref.dtype)
    out_ref[...] = out.astype(out_ref.dtype)


@jax.jit
def sdpa_model(q, k, v, attn_mask):
    """Reproduces Model.forward; returns (q, k, v, attn_mask, attn_weight, output)."""
    B, H, S, D = q.shape
    assert k.shape == (B, H, S, D) and v.shape == (B, H, S, D)
    assert attn_mask.shape == (B, H, S, S)
    BH = B * H

    # Free metadata reshapes: fold (B, H) into one batch axis.
    q3 = q.reshape(BH, S, D)
    k3 = k.reshape(BH, S, D)
    v3 = v.reshape(BH, S, D)
    m3 = attn_mask.reshape(BH, S, S)        # keep bool; cast happens in-kernel

    vmem = pl.BlockSpec(memory_space=pltpu.MemorySpace.VMEM)

    # Advisory cost hint for XLA's scheduler around the custom call.
    flops = 2 * (2 * BH * S * S * D)                      # two matmuls
    transcendentals = BH * S * S                          # exp in softmax
    bytes_accessed = (
        3 * BH * S * D * q.dtype.itemsize                 # q, k, v in
        + BH * S * S * 1                                  # bool mask in
        + BH * S * S * q.dtype.itemsize                   # attn_weight out
        + BH * S * D * q.dtype.itemsize                   # output out
    )

    attn_weight, output = pl.pallas_call(
        _sdpa_kernel,
        out_shape=(
            jax.ShapeDtypeStruct((BH, S, S), q.dtype),    # attn_weight
            jax.ShapeDtypeStruct((BH, S, D), q.dtype),    # output
        ),
        in_specs=[vmem, vmem, vmem, vmem],
        out_specs=(vmem, vmem),
        cost_estimate=pl.CostEstimate(
            flops=flops,
            transcendentals=transcendentals,
            bytes_accessed=bytes_accessed,
        ),
    )(q3, k3, v3, m3)

    return (
        q,
        k,
        v,
        attn_mask,
        attn_weight.reshape(B, H, S, S),
        output.reshape(B, H, S, D),
    )


if __name__ == "__main__":
    key = jax.random.PRNGKey(0)
    kq, kk, kv = jax.random.split(key, 3)

    B, H, S, D = 1, 3, 64, 64
    q = jax.random.normal(kq, (B, H, S, D), dtype=jnp.float32)
    k = jax.random.normal(kk, (B, H, S, D), dtype=jnp.float32)
    v = jax.random.normal(kv, (B, H, S, D), dtype=jnp.float32)
    attn_mask = jnp.ones((B, H, S, S), dtype=jnp.bool_)

    outs = jax.block_until_ready(sdpa_model(q, k, v, attn_mask))

    # lightweight sanity check against a pure-JAX reference
    s_ref = jnp.einsum("bhqd,bhkd->bhqk", q, k)
    attn_ref = jax.nn.softmax(s_ref, axis=-1) * attn_mask.astype(jnp.float32)
    out_ref = jnp.einsum("bhqk,bhkd->bhqd", attn_ref, v) * attn_mask.astype(jnp.float32)
    assert jnp.allclose(outs[4], attn_ref, atol=1e-5, rtol=1e-5)
    assert jnp.allclose(outs[5], out_ref, atol=1e-4, rtol=1e-4)

    print("KERNEL_OK")
</pallas_src>

<mosaic_0001>
module attributes {stable_mosaic.version = 11 : i64} {
  func.func @_sdpa_kernel(%arg0: memref<3x64x64xf32, #tpu.memory_space<vmem>>, %arg1: memref<3x64x64xf32, #tpu.memory_space<vmem>>, %arg2: memref<3x64x64xf32, #tpu.memory_space<vmem>>, %arg3: memref<3x64x64xi32, #tpu.memory_space<vmem>>, %arg4: memref<3x64x64xf32, #tpu.memory_space<vmem>>, %arg5: memref<3x64x64xf32, #tpu.memory_space<vmem>>) attributes {dimension_semantics = [], scalar_prefetch = 0 : i64, scratch_operands = 0 : i64, tpu.core_type = #tpu.core_type<tc>} {
    %c0 = arith.constant 0 : index
    %c0_0 = arith.constant 0 : index
    %c0_1 = arith.constant 0 : index
    %0 = vector.load %arg0[%c0, %c0_0, %c0_1] : memref<3x64x64xf32, #tpu.memory_space<vmem>>, vector<3x64x64xf32>
    %c0_2 = arith.constant 0 : index
    %c0_3 = arith.constant 0 : index
    %c0_4 = arith.constant 0 : index
    %1 = vector.load %arg1[%c0_2, %c0_3, %c0_4] : memref<3x64x64xf32, #tpu.memory_space<vmem>>, vector<3x64x64xf32>
    %c0_5 = arith.constant 0 : index
    %c0_6 = arith.constant 0 : index
    %c0_7 = arith.constant 0 : index
    %2 = vector.load %arg2[%c0_5, %c0_6, %c0_7] : memref<3x64x64xf32, #tpu.memory_space<vmem>>, vector<3x64x64xf32>
    %c0_8 = arith.constant 0 : index
    %c0_9 = arith.constant 0 : index
    %c0_10 = arith.constant 0 : index
    %3 = vector.load %arg3[%c0_8, %c0_9, %c0_10] : memref<3x64x64xi32, #tpu.memory_space<vmem>>, vector<3x64x64xi32>
    %cst = arith.constant dense<0> : vector<3x64x64xi32>
    %4 = arith.cmpi ne, %3, %cst : vector<3x64x64xi32>
    %5 = arith.extui %4 : vector<3x64x64xi1> to vector<3x64x64xi32>
    %6 = arith.sitofp %5 : vector<3x64x64xi32> to vector<3x64x64xf32>
    %cst_11 = arith.constant dense<0.000000e+00> : vector<3x64x64xf32>
    %7 = tpu.matmul %0, %1, %cst_11 {dimension_numbers = #tpu.dot_dimension_numbers<[2], [2], [1], [1], [0, 0, 0, 1, 1, 1], [0], [0]>} : vector<3x64x64xf32>, vector<3x64x64xf32>, vector<3x64x64xf32> -> vector<3x64x64xf32>
    %cst_12 = arith.constant dense<0xFF800000> : vector<3x64xf32>
    %8 = vector.multi_reduction <maximumf>, %7, %cst_12 [2] : vector<3x64x64xf32> to vector<3x64xf32>
    %9 = vector.shape_cast %8 : vector<3x64xf32> to vector<3x64x1xf32>
    %10 = vector.broadcast %9 : vector<3x64x1xf32> to vector<3x64x64xf32>
    %11 = arith.subf %7, %10 : vector<3x64x64xf32>
    %12 = math.exp %11 : vector<3x64x64xf32>
    %cst_13 = arith.constant dense<0.000000e+00> : vector<3x64xf32>
    %13 = vector.multi_reduction <add>, %12, %cst_13 [2] : vector<3x64x64xf32> to vector<3x64xf32>
    %14 = vector.shape_cast %13 : vector<3x64xf32> to vector<3x64x1xf32>
    %15 = tpu.reciprocal %14 : vector<3x64x1xf32> -> vector<3x64x1xf32>
    %16 = vector.broadcast %15 : vector<3x64x1xf32> to vector<3x64x64xf32>
    %17 = arith.mulf %12, %16 : vector<3x64x64xf32>
    %18 = arith.mulf %17, %6 : vector<3x64x64xf32>
    %cst_14 = arith.constant dense<0.000000e+00> : vector<3x64x64xf32>
    %19 = tpu.matmul %18, %2, %cst_14 {dimension_numbers = #tpu.dot_dimension_numbers<[2], [1], [1], [2], [0, 0, 0, 1, 1, 2], [0], [0]>} : vector<3x64x64xf32>, vector<3x64x64xf32>, vector<3x64x64xf32> -> vector<3x64x64xf32>
    %20 = arith.mulf %19, %6 : vector<3x64x64xf32>
    %c0_15 = arith.constant 0 : index
    %c0_16 = arith.constant 0 : index
    %c0_17 = arith.constant 0 : index
    %21 = vector.load %arg4[%c0_15, %c0_16, %c0_17] : memref<3x64x64xf32, #tpu.memory_space<vmem>>, vector<3x64x64xf32>
    tpu.vector_store %arg4[%c0_15, %c0_16, %c0_17], %18 {strides = array<i32>} : memref<3x64x64xf32, #tpu.memory_space<vmem>>, vector<3x64x64xf32>,
    %c0_18 = arith.constant 0 : index
    %c0_19 = arith.constant 0 : index
    %c0_20 = arith.constant 0 : index
    %22 = vector.load %arg5[%c0_18, %c0_19, %c0_20] : memref<3x64x64xf32, #tpu.memory_space<vmem>>, vector<3x64x64xf32>
    tpu.vector_store %arg5[%c0_18, %c0_19, %c0_20], %20 {strides = array<i32>} : memref<3x64x64xf32, #tpu.memory_space<vmem>>, vector<3x64x64xf32>,
    return
  }
}

</mosaic_0001>

<bundles_post_ra>
// kernel: sdpa_model.1
= control target key start
LH: loop header
LB: loop body
LE: loop exit
PB: predicated region body
PF: predicated region fallthrough
CT: control target
= control target key end

     0   :  { %11 = vsyncpa [#allocation3], 0  ;;  %s2801_s0 = inlined_call_operand.vmem [shape: f32[3,64,64], index: 0, kind: input, shape index: {}]   ;;  %s2802_s1 = inlined_call_operand.hbm [shape: f32[3,64,64], index: 1, kind: input, shape index: {}]   ;;  %s2803_s2 = inlined_call_operand.hbm [shape: f32[3,64,64], index: 2, kind: input, shape index: {}]   ;;  %s2804_s3 = inlined_call_operand.vmem [shape: s32[3,64,64], index: 3, kind: input, shape index: {}]   ;;  %s2805_s4 = inlined_call_operand.hbm [shape: f32[3,64,64], index: 4, kind: output, shape index: {0}]   ;;  %s2806_s5 = inlined_call_operand.hbm [shape: f32[3,64,64], index: 5, kind: output, shape index: {1}]  }
   0x1   :  { %12 = vsyncpa [#allocation6], 0 }
   0x2   :  { %13 = vsyncpa [#allocation4], 0 }
   0x3   :  { %14 = vsyncpa [#allocation9], 0  ;;  %s2025_s18 = smov [#allocation2]  }
   0x4   :  { %s22_s19 = sshll.u32 %s2025_s18, 4  ;;  %s23_s19 = int_to_ptr.vmem [resolvable:$true] %s22_s19 }
   0x5   :  { %s1945_s20 = scalar_lea.vmem %s23_s19, 3072  ;;  %p1950_p1 = scmp.lt.s32.totalorder %s23_s19, %s23_s19 }
   0x6   :  { %p1946_p0 = scmp.ne.s32.totalorder %s23_s19, %s1945_s20  ;;  %p1951_p2 = scmp.lt.s32.totalorder %s1945_s20, %s1945_s20 }
   0x8   :  { %p1952_p3 = por %p1951_p2, %p1950_p1 }
   0xa   :  { %p1953_p4 = pnand %p1952_p3, %p1946_p0 }
   0xc   :  { %1956 = shalt.err (!%p1953_p4)
}
   0xd   :  { %s2026_s21 = smov 128   ;;  %s2027_s22 = smov 8  }
   0xe   :  { %28 = dma.hbm_to_vmem [thread:$0]  %s2802_s1, 3072, %s23_s19, [#allocation3], %s2026_s21, %s2026_s21, %s2027_s22  }
   0xf   :  { %s2028_s25 = smov [#allocation5]  }
  0x10   :  { %s34_s26 = sshll.u32 %s2028_s25, 4  ;;  %s35_s26 = int_to_ptr.vmem [resolvable:$true] %s34_s26 }
  0x11   :  { %s1965_s27 = scalar_lea.vmem %s35_s26, 3072  ;;  %p1970_p6 = scmp.lt.s32.totalorder %s35_s26, %s35_s26 }
  0x12   :  { %p1966_p5 = scmp.ne.s32.totalorder %s35_s26, %s1965_s27  ;;  %p1971_p7 = scmp.lt.s32.totalorder %s1965_s27, %s1965_s27 }
  0x14   :  { %p1972_p8 = por %p1971_p7, %p1970_p6 }
  0x16   :  { %p1973_p9 = pnand %p1972_p8, %p1966_p5 }
  0x18   :  { %1976 = shalt.err (!%p1973_p9)
}
  0x19   :  { %40 = dma.hbm_to_vmem [thread:$0]  %s2803_s2, 3072, %s35_s26, [#allocation6], %s2026_s21, %s2026_s21, %s2027_s22  }
  0x1a   :  { %2017 = dma.done.wait [#allocation3], 3072  }
  0x1b   :  { %2018 = vsyncadd [#allocation3], 4294964224 }
  0x1c   :  { %2019 = dma.done.wait [#allocation6], 3072  }
  0x1d   :  { %2020 = vsyncadd [#allocation6], 4294964224  ;;  %vm217_vm0 = vcmask 523264   ;;  %v80_v0 = vld [vmem:[#allocation2 + $0x38] sm:$0xff]  ;;  %v79_v2 = vld [vmem:[#allocation2 + $0x30] sm:$0xff] }
  0x1e   :  { %v88_v1 = vld [vmem:[#allocation2 + $0x78] sm:$0xff]  ;;  %1650 = vmatprep.subr.msk.mxu0 %vm217_vm0, %v80_v0  ;;  %v87_v3 = vld [vmem:[#allocation2 + $0x70] sm:$0xff]  ;;  %v78_v4 = vld [vmem:[#allocation2 + $0x28] sm:$0xff] }
  0x1f   :  { %1678 = vmatprep.subr.msk.mxu1 %vm217_vm0, %v88_v1  ;;  %1651 = vmatpush3.xpose.msk.msra.mxu0 %vm217_vm0, %v80_v0  ;;  %v86_v5 = vld [vmem:[#allocation2 + $0x68] sm:$0xff]  ;;  %v49_v6 = vld [vmem:[%s2801_s0] sm:$0xff]  ;;  %v76_v10 = vld [vmem:[#allocation2 + $0x18] sm:$0xff] }
  0x20   :  { %1679 = vmatpush3.xpose.msk.msra.mxu1 %vm217_vm0, %v88_v1  ;;  %1652 = vmatprep.subr.msk.mxu0 %vm217_vm0, %v79_v2  ;;  %v57_v7 = vld [vmem:[%s2801_s0 + $0x40] sm:$0xff]  ;;  %v84_v11 = vld [vmem:[#allocation2 + $0x58] sm:$0xff]  ;;  %v75_v12 = vld [vmem:[#allocation2 + $0x10] sm:$0xff] }
  0x21   :  { %1680 = vmatprep.subr.msk.mxu1 %vm217_vm0, %v87_v3  ;;  %v77_v8 = vld [vmem:[#allocation2 + $0x20] sm:$0xff]  ;;  %1666 = vmatprep.mubr.msk.f32.mxu0 %vm217_vm0, %v49_v6  ;;  %v83_v13 = vld [vmem:[#allocation2 + $0x50] sm:$0xff]  ;;  %v74_v14 = vld [vmem:[#allocation2 + $0x8] sm:$0xff] }
  0x22   :  { %v85_v9 = vld [vmem:[#allocation2 + $0x60] sm:$0xff]  ;;  %1694 = vmatprep.mubr.msk.f32.mxu1 %vm217_vm0, %v57_v7  ;;  %v82_v15 = vld [vmem:[#allocation2 + $0x48] sm:$0xff]  ;;  %v96_v18 = vld [vmem:[#allocation2 + $0xb8] sm:$0xff] }
  0x23   :  { %1653 = vmatpush3.xpose.msk.msra.mxu0 %vm217_vm0, %v79_v2  ;;  %v73_v16 = vld [vmem:[#allocation2] sm:$0xff]  ;;  %v50_v19 = vld [vmem:[%s2801_s0 + $0x8] sm:$0xff]  ;;  %v51_v21 = vld [vmem:[%s2801_s0 + $0x10] sm:$0xff] }
  0x24   :  { %1681 = vmatpush3.xpose.msk.msra.mxu1 %vm217_vm0, %v87_v3  ;;  %1654 = vmatprep.subr.msk.mxu0 %vm217_vm0, %v78_v4  ;;  %v81_v17 = vld [vmem:[#allocation2 + $0x40] sm:$0xff]  ;;  %v58_v20 = vld [vmem:[%s2801_s0 + $0x48] sm:$0xff]  ;;  %v95_v22 = vld [vmem:[#allocation2 + $0xb0] sm:$0xff] }
  0x25   :  { %1682 = vmatprep.subr.msk.mxu1 %vm217_vm0, %v86_v5  ;;  %v59_v23 = vld [vmem:[%s2801_s0 + $0x50] sm:$0xff]  ;;  %v52_v24 = vld [vmem:[%s2801_s0 + $0x18] sm:$0xff]  ;;  %v53_v26 = vld [vmem:[%s2801_s0 + $0x20] sm:$0xff] }
  0x26   :  { %v60_v25 = vld [vmem:[%s2801_s0 + $0x58] sm:$0xff]  ;;  %v94_v27 = vld [vmem:[#allocation2 + $0xa8] sm:$0xff]  ;;  %v61_v28 = vld [vmem:[%s2801_s0 + $0x60] sm:$0xff] }
  0x27   :  { %1655 = vmatpush3.xpose.msk.msra.mxu0 %vm217_vm0, %v78_v4  ;;  %v54_v29 = vld [vmem:[%s2801_s0 + $0x28] sm:$0xff]  ;;  %v55_v31 = vld [vmem:[%s2801_s0 + $0x30] sm:$0xff]  ;;  %v93_v32 = vld [vmem:[#allocation2 + $0xa0] sm:$0xff] }
  0x28   :  { %1683 = vmatpush3.xpose.msk.msra.mxu1 %vm217_vm0, %v86_v5  ;;  %1656 = vmatprep.subr.msk.mxu0 %vm217_vm0, %v77_v8  ;;  %v62_v30 = vld [vmem:[%s2801_s0 + $0x68] sm:$0xff]  ;;  %v63_v33 = vld [vmem:[%s2801_s0 + $0x70] sm:$0xff]  ;;  %v56_v34 = vld [vmem:[%s2801_s0 + $0x38] sm:$0xff] }
  0x29   :  { %1684 = vmatprep.subr.msk.mxu1 %vm217_vm0, %v85_v9  ;;  %v64_v35 = vld [vmem:[%s2801_s0 + $0x78] sm:$0xff]  ;;  %v65_v36 = vld [vmem:[%s2801_s0 + $0x80] sm:$0xff]  ;;  %v91_v38 = vld [vmem:[#allocation2 + $0x90] sm:$0xff] }
  0x2a   :  { %v92_v37 = vld [vmem:[#allocation2 + $0x98] sm:$0xff]  ;;  %v90_v39 = vld [vmem:[#allocation2 + $0x88] sm:$0xff]  ;;  %v89_v40 = vld [vmem:[#allocation2 + $0x80] sm:$0xff] }
  0x2b   :  { %1657 = vmatpush3.xpose.msk.msra.mxu0 %vm217_vm0, %v77_v8  ;;  %v66_v41 = vld [vmem:[%s2801_s0 + $0x88] sm:$0xff]  ;;  %v67_v42 = vld [vmem:[%s2801_s0 + $0x90] sm:$0xff]  ;;  %v68_v43 = vld [vmem:[%s2801_s0 + $0x98] sm:$0xff] }
  0x2c   :  { %1685 = vmatpush3.xpose.msk.msra.mxu1 %vm217_vm0, %v85_v9  ;;  %1658 = vmatprep.subr.msk.mxu0 %vm217_vm0, %v76_v10  ;;  %v69_v44 = vld [vmem:[%s2801_s0 + $0xa0] sm:$0xff]  ;;  %v70_v45 = vld [vmem:[%s2801_s0 + $0xa8] sm:$0xff]  ;;  %v71_v46 = vld [vmem:[%s2801_s0 + $0xb0] sm:$0xff] }
  0x2d   :  { %1686 = vmatprep.subr.msk.mxu1 %vm217_vm0, %v84_v11  ;;  %v72_v47 = vld [vmem:[%s2801_s0 + $0xb8] sm:$0xff] }
  0x2f   :  { %1659 = vmatpush3.xpose.msk.msra.mxu0 %vm217_vm0, %v76_v10 }
  0x30   :  { %1687 = vmatpush3.xpose.msk.msra.mxu1 %vm217_vm0, %v84_v11  ;;  %1660 = vmatprep.subr.msk.mxu0 %vm217_vm0, %v75_v12 }
  0x31   :  { %1688 = vmatprep.subr.msk.mxu1 %vm217_vm0, %v83_v13 }
  0x33   :  { %1661 = vmatpush3.xpose.msk.msra.mxu0 %vm217_vm0, %v75_v12 }
  0x34   :  { %1689 = vmatpush3.xpose.msk.msra.mxu1 %vm217_vm0, %v83_v13  ;;  %1662 = vmatprep.subr.msk.mxu0 %vm217_vm0, %v74_v14 }
  0x35   :  { %1690 = vmatprep.subr.msk.mxu1 %vm217_vm0, %v82_v15 }
  0x37   :  { %1663 = vmatpush3.xpose.msk.msra.mxu0 %vm217_vm0, %v74_v14 }
  0x38   :  { %1691 = vmatpush3.xpose.msk.msra.mxu1 %vm217_vm0, %v82_v15  ;;  %1664 = vmatprep.subr.msk.mxu0 %vm217_vm0, %v73_v16 }
  0x39   :  { %1692 = vmatprep.subr.msk.mxu1 %vm217_vm0, %v81_v17 }
  0x3b   :  { %1665 = vmatpush3.xpose.msk.msra.mxu0 %vm217_vm0, %v73_v16 }
  0x3c   :  { %1693 = vmatpush3.xpose.msk.msra.mxu1 %vm217_vm0, %v81_v17  ;;  %1706 = vmatprep.subr.msk.mxu0 %vm217_vm0, %v96_v18 }
  0x3e   :  { %1667 = vmatmul.mubr.msk.f32.vlgmr.msra.gmra.mxu0 %vm217_vm0, %v50_v19 }
  0x3f   :  { %1695 = vmatmul.mubr.msk.f32.vlgmr.msra.gmra.mxu1 %vm217_vm0, %v58_v20  ;;  %1707 = vmatpush3.xpose.msk.msra.mxu0 %vm217_vm0, %v96_v18 }
  0x40   :  { %1669 = vmatprep.mubr.msk.f32.mxu0 %vm217_vm0, %v51_v21  ;;  %1708 = vmatprep.subr.msk.mxu0 %vm217_vm0, %v95_v22 }
  0x41   :  { %1697 = vmatprep.mubr.msk.f32.mxu1 %vm217_vm0, %v59_v23 }
  0x42   :  { %1670 = vmatmul.mubr.msk.f32.gmra.mxu0 %vm217_vm0, %v52_v24 }
  0x43   :  { %1698 = vmatmul.mubr.msk.f32.gmra.mxu1 %vm217_vm0, %v60_v25  ;;  %1709 = vmatpush3.xpose.msk.msra.mxu0 %vm217_vm0, %v95_v22 }
  0x44   :  { %1672 = vmatprep.mubr.msk.f32.mxu0 %vm217_vm0, %v53_v26  ;;  %1710 = vmatprep.subr.msk.mxu0 %vm217_vm0, %v94_v27 }
  0x45   :  { %1700 = vmatprep.mubr.msk.f32.mxu1 %vm217_vm0, %v61_v28 }
  0x46   :  { %1673 = vmatmul.mubr.msk.f32.gmra.mxu0 %vm217_vm0, %v54_v29 }
  0x47   :  { %1701 = vmatmul.mubr.msk.f32.gmra.mxu1 %vm217_vm0, %v62_v30  ;;  %1711 = vmatpush3.xpose.msk.msra.mxu0 %vm217_vm0, %v94_v27 }
  0x48   :  { %1675 = vmatprep.mubr.msk.f32.mxu0 %vm217_vm0, %v55_v31  ;;  %1712 = vmatprep.subr.msk.mxu0 %vm217_vm0, %v93_v32 }
  0x49   :  { %1703 = vmatprep.mubr.msk.f32.mxu1 %vm217_vm0, %v63_v33 }
  0x4a   :  { %1676 = vmatmul.mubr.msk.f32.gmra.mxu0 %vm217_vm0, %v56_v34 }
  0x4b   :  { %1704 = vmatmul.mubr.msk.f32.gmra.mxu1 %vm217_vm0, %v64_v35  ;;  %1713 = vmatpush3.xpose.msk.msra.mxu0 %vm217_vm0, %v93_v32 }
  0x4c   :  { %1722 = vmatprep.mubr.msk.f32.mxu0 %vm217_vm0, %v65_v36  ;;  %1714 = vmatprep.subr.msk.mxu0 %vm217_vm0, %v92_v37 }
  0x4f   :  { %1715 = vmatpush3.xpose.msk.msra.mxu0 %vm217_vm0, %v92_v37 }
  0x50   :  { %1716 = vmatprep.subr.msk.mxu0 %vm217_vm0, %v91_v38 }
  0x53   :  { %1717 = vmatpush3.xpose.msk.msra.mxu0 %vm217_vm0, %v91_v38 }
  0x54   :  { %1718 = vmatprep.subr.msk.mxu0 %vm217_vm0, %v90_v39 }
  0x57   :  { %1719 = vmatpush3.xpose.msk.msra.mxu0 %vm217_vm0, %v90_v39 }
  0x58   :  { %1720 = vmatprep.subr.msk.mxu0 %vm217_vm0, %v89_v40 }
  0x5b   :  { %1721 = vmatpush3.xpose.msk.msra.mxu0 %vm217_vm0, %v89_v40 }
  0x5e   :  { %1723 = vmatmul.mubr.msk.f32.vlgmr.msra.gmra.mxu0 %vm217_vm0, %v66_v41 }
  0x5f   :  { %1725 = vmatprep.mubr.msk.f32.mxu0 %vm217_vm0, %v67_v42 }
  0x62   :  { %1726 = vmatmul.mubr.msk.f32.gmra.mxu0 %vm217_vm0, %v68_v43 }
  0x63   :  { %1728 = vmatprep.mubr.msk.f32.mxu0 %vm217_vm0, %v69_v44 }
  0x66   :  { %1729 = vmatmul.mubr.msk.f32.gmra.mxu0 %vm217_vm0, %v70_v45 }
  0x67   :  { %1731 = vmatprep.mubr.msk.f32.mxu0 %vm217_vm0, %v71_v46 }
  0x6a   :  { %1732 = vmatmul.mubr.msk.f32.gmra.mxu0 %vm217_vm0, %v72_v47 }
  0xfe   :  { %v2218_v48 = vpop.f32.mrf.mxu0 }
  0xff   :  { %v2220_v49 = vpop.f32.mrf.mxu1  ;;  %v680_v51 = vsel %vm217_vm0, %v2218_v48, -inf }
 0x100   :  { %v704_v50 = vsel %vm217_vm0, %v2220_v49, -inf  ;;  %681 = vmax.xlane.f32.xlu0 %v680_v51  ;;  %v2226_v52 = vpop.f32.mrf.mxu0 }
 0x101   :  { %705 = vmax.xlane.f32.xlu1 %v704_v50  ;;  %v2228_v53 = vpop.f32.mrf.mxu1  ;;  %v677_v56 = vsel %vm217_vm0, %v2226_v52, -inf }
 0x102   :  { %v2230_v54 = vpop.f32.mrf.mxu0  ;;  %v701_v59 = vsel %vm217_vm0, %v2228_v53, -inf }
 0x103   :  { %v2232_v55 = vpop.f32.mrf.mxu1  ;;  %v686_v57 = vsel %vm217_vm0, %v2230_v54, -inf }
 0x104   :  { %678 = vmax.xlane.f32.xlu0 %v677_v56  ;;  %v2238_v58 = vpop.f32.mrf.mxu0  ;;  %v710_v8 = vsel %vm217_vm0, %v2232_v55, -inf }
 0x105   :  { %687 = vmax.xlane.f32.xlu1 %v686_v57  ;;  %v683_v60 = vsel %vm217_vm0, %v2238_v58, -inf  ;;  %v2246_v62 = vpop.f32.mrf.mxu1 }
 0x106   :  { %v2244_v61 = vpop.f32.mrf.mxu0  ;;  %v707_v9 = vsel %vm217_vm0, %v2246_v62, -inf }
 0x107   :  { %v692_v0 = vsel %vm217_vm0, %v2244_v61, -inf  ;;  %v2256_v3 = vpop.f32.mrf.mxu1 }
 0x108   :  { %702 = vmax.xlane.f32.xlu0 %v701_v59  ;;  %v2248_v63 = vpop.f32.mrf.mxu0  ;;  %v716_v11 = vsel %vm217_vm0, %v2256_v3, -inf }
 0x109   :  { %684 = vmax.xlane.f32.xlu1 %v683_v60  ;;  %v689_v1 = vsel %vm217_vm0, %v2248_v63, -inf  ;;  %v2264_v7 = vpop.f32.mrf.mxu1 }
 0x10a   :  { %v2254_v2 = vpop.f32.mrf.mxu0  ;;  %v713_v12 = vsel %vm217_vm0, %v2264_v7, -inf }
 0x10b   :  { %v698_v5 = vsel %vm217_vm0, %v2254_v2, -inf  ;;  %v2270_v10 = vpop.f32.mrf.mxu1 }
 0x10c   :  { %690 = vmax.xlane.f32.xlu0 %v689_v1  ;;  %v2258_v4 = vpop.f32.mrf.mxu0  ;;  %v722_v14 = vsel %vm217_vm0, %v2270_v10, -inf }
 0x10d   :  { %693 = vmax.xlane.f32.xlu1 %v692_v0  ;;  %v695_v6 = vsel %vm217_vm0, %v2258_v4, -inf  ;;  %v2276_v13 = vpop.f32.mrf.mxu1 }
 0x10e   :  { %v719_v15 = vsel %vm217_vm0, %v2276_v13, -inf }
 0x110   :  { %696 = vmax.xlane.f32.xlu0 %v695_v6 }
 0x111   :  { %699 = vmax.xlane.f32.xlu1 %v698_v5 }
 0x114   :  { %708 = vmax.xlane.f32.xlu0 %v707_v9 }
 0x115   :  { %711 = vmax.xlane.f32.xlu1 %v710_v8 }
 0x118   :  { %714 = vmax.xlane.f32.xlu0 %v713_v12 }
 0x119   :  { %717 = vmax.xlane.f32.xlu1 %v716_v11 }
 0x11c   :  { %720 = vmax.xlane.f32.xlu0 %v719_v15 }
 0x11d   :  { %723 = vmax.xlane.f32.xlu1 %v722_v14 }
 0x11e   :  { %v2282_v16 = vpop.f32.mrf.mxu0 }
 0x11f   :  { %v728_v17 = vsel %vm217_vm0, %v2282_v16, -inf }
 0x120   :  { %729 = vmax.xlane.f32.xlu0 %v728_v17  ;;  %v2286_v18 = vpop.f32.mrf.mxu0 }
 0x121   :  { %v725_v20 = vsel %vm217_vm0, %v2286_v18, -inf }
 0x122   :  { %v2288_v19 = vpop.f32.mrf.mxu0 }
 0x123   :  { %v734_v27 = vsel %vm217_vm0, %v2288_v19, -inf }
 0x124   :  { %726 = vmax.xlane.f32.xlu0 %v725_v20  ;;  %v2292_v21 = vpop.f32.mrf.mxu0 }
 0x125   :  { %v731_v23 = vsel %vm217_vm0, %v2292_v21, -inf }
 0x126   :  { %v2294_v22 = vpop.f32.mrf.mxu0 }
 0x127   :  { %v740_v24 = vsel %vm217_vm0, %v2294_v22, -inf }
 0x128   :  { %732 = vmax.xlane.f32.xlu0 %v731_v23  ;;  %741 = vmax.xlane.f32.xlu1 %v740_v24  ;;  %v2300_v25 = vpop.f32.mrf.mxu0 }
 0x129   :  { %v737_v28 = vsel %vm217_vm0, %v2300_v25, -inf }
 0x12a   :  { %v2302_v26 = vpop.f32.mrf.mxu0 }
 0x12b   :  { %v746_v31 = vsel %vm217_vm0, %v2302_v26, -inf }
 0x12c   :  { %735 = vmax.xlane.f32.xlu0 %v734_v27  ;;  %738 = vmax.xlane.f32.xlu1 %v737_v28  ;;  %v2308_v29 = vpop.f32.mrf.mxu0 }
 0x12d   :  { %v743_v30 = vsel %vm217_vm0, %v2308_v29, -inf }
 0x130   :  { %744 = vmax.xlane.f32.xlu1 %v743_v30 }
 0x134   :  { %747 = vmax.xlane.f32.xlu1 %v746_v31 }
 0x189   :  { %v682_v33 = vpop.xlane.xlu0 %681 }
 0x18a   :  { %v706_v32 = vpop.xlane.xlu1 %705  ;;  %v750_v35 = vsub.f32 %v2218_v48, %v682_v33 }
 0x18b   :  { %v758_v34 = vsub.f32 %v2220_v49, %v706_v32 }
 0x18c   :  { %v775_v36 = vmul.f32 1.442695, %v750_v35 }
 0x18d   :  { %v791_v37 = vmul.f32 1.442695, %v758_v34  ;;  %v679_v38 = vpop.xlane.xlu0 %678 }
 0x18e   :  { %v688_v39 = vpop.xlane.xlu1 %687  ;;  %v749_v40 = vsub.f32 %v2226_v52, %v679_v38  ;;  %1841 = vpow2.f32 %v775_v36 }
 0x18f   :  { %v752_v41 = vsub.f32 %v2230_v54, %v688_v39  ;;  %1843 = vpow2.f32 %v791_v37 }
 0x190   :  { %v773_v42 = vmul.f32 1.442695, %v749_v40 }
 0x191   :  { %v779_v43 = vmul.f32 1.442695, %v752_v41  ;;  %v703_v44 = vpop.xlane.xlu0 %702 }
 0x192   :  { %v685_v45 = vpop.xlane.xlu1 %684  ;;  %1845 = vpow2.f32 %v773_v42  ;;  %v757_v46 = vsub.f32 %v2228_v53, %v703_v44 }
 0x193   :  { %v751_v47 = vsub.f32 %v2238_v58, %v685_v45  ;;  %1847 = vpow2.f32 %v779_v43 }
 0x194   :  { %v789_v48 = vmul.f32 1.442695, %v757_v46 }
 0x195   :  { %v777_v49 = vmul.f32 1.442695, %v751_v47  ;;  %v691_v51 = vpop.xlane.xlu0 %690 }
 0x196   :  { %v694_v50 = vpop.xlane.xlu1 %693  ;;  %1849 = vpow2.f32 %v789_v48  ;;  %v753_v54 = vsub.f32 %v2248_v63, %v691_v51  ;;  %v104_v48 = vld [vmem:[#allocation5 + $0x38] sm:$0xff] }
 0x197   :  { %v754_v52 = vsub.f32 %v2244_v61, %v694_v50  ;;  %1851 = vpow2.f32 %v777_v49  ;;  %1734 = vmatprep.subr.mxu1 %v104_v48 }
 0x198   :  { %v781_v57 = vmul.f32 1.442695, %v753_v54  ;;  %1735 = vmatpush3.msra.mxu1 %v104_v48  ;;  %v103_v54 = vld [vmem:[#allocation5 + $0x30] sm:$0xff] }
 0x199   :  { %v783_v56 = vmul.f32 1.442695, %v754_v52  ;;  %v697_v60 = vpop.xlane.xlu0 %696  ;;  %1736 = vmatprep.subr.mxu1 %v103_v54 }
 0x19a   :  { %v700_v59 = vpop.xlane.xlu1 %699  ;;  %v755_v58 = vsub.f32 %v2258_v4, %v697_v60  ;;  %1737 = vmatpush3.msra.mxu1 %v103_v54  ;;  %v102_v60 = vld [vmem:[#allocation5 + $0x28] sm:$0xff]  ;;  %v2441_v54 = vld [vmem:[#allocation5 + $0xb0] sm:$0xff] }
 0x19b   :  { %1853 = vpow2.f32 %v783_v56  ;;  %v756_v53 = vsub.f32 %v2254_v2, %v700_v59  ;;  %v2324_v0 = vpop.eup %1841  ;;  %1738 = vmatprep.subr.mxu1 %v102_v60 }
 0x19c   :  { %1855 = vpow2.f32 %v781_v57  ;;  %v785_v5 = vmul.f32 1.442695, %v755_v58  ;;  %v824_v61 = vsel %vm217_vm0, %v2324_v0, 0.0  ;;  %v2328_v63 = vpop.eup %1843  ;;  %1739 = vmatpush3.msra.mxu1 %v102_v60  ;;  %v2461_v60 = vld [vmem:[#allocation5 + $0x88] sm:$0xff] }
 0x19d   :  { %v787_v1 = vmul.f32 1.442695, %v756_v53  ;;  %v709_v8 = vpop.xlane.xlu0 %708  ;;  %825 = vadd.xlane.f32.xlu1 %v824_v61  ;;  %v848_v20 = vsel %vm217_vm0, %v2328_v63, 0.0 }
 0x19e   :  { %v712_v6 = vpop.xlane.xlu1 %711  ;;  %v759_v11 = vsub.f32 %v2246_v62, %v709_v8 }
 0x19f   :  { %1857 = vpow2.f32 %v787_v1  ;;  %v760_v9 = vsub.f32 %v2232_v55, %v712_v6  ;;  %v2332_v2 = vpop.eup %1845 }
 0x1a0   :  { %1859 = vpow2.f32 %v785_v5  ;;  %v793_v12 = vmul.f32 1.442695, %v759_v11  ;;  %v821_v14 = vsel %vm217_vm0, %v2332_v2, 0.0  ;;  %v2338_v23 = vpop.eup %1847 }
 0x1a1   :  { %v795_v4 = vmul.f32 1.442695, %v760_v9  ;;  %v715_v17 = vpop.xlane.xlu0 %714  ;;  %822 = vadd.xlane.f32.xlu0 %v821_v14  ;;  %849 = vadd.xlane.f32.xlu1 %v848_v20  ;;  %v830_v34 = vsel %vm217_vm0, %v2338_v23, 0.0 }
 0x1a2   :  { %v718_v15 = vpop.xlane.xlu1 %717  ;;  %v761_v62 = vsub.f32 %v2264_v7, %v715_v17 }
 0x1a3   :  { %1861 = vpow2.f32 %v795_v4  ;;  %v762_v55 = vsub.f32 %v2256_v3, %v718_v15  ;;  %v2342_v24 = vpop.eup %1849  ;;  %v100_v4 = vld [vmem:[#allocation5 + $0x18] sm:$0xff] }
 0x1a4   :  { %1863 = vpow2.f32 %v793_v12  ;;  %v797_v28 = vmul.f32 1.442695, %v761_v62  ;;  %v845_v30 = vsel %vm217_vm0, %v2342_v24, 0.0  ;;  %v2346_v31 = vpop.eup %1851 }
 0x1a5   :  { %v799_v27 = vmul.f32 1.442695, %v762_v55  ;;  %v721_v33 = vpop.xlane.xlu0 %720  ;;  %846 = vadd.xlane.f32.xlu0 %v845_v30  ;;  %831 = vadd.xlane.f32.xlu1 %v830_v34  ;;  %v827_v38 = vsel %vm217_vm0, %v2346_v31, 0.0 }
 0x1a6   :  { %v724_v32 = vpop.xlane.xlu1 %723  ;;  %v763_v7 = vsub.f32 %v2276_v13, %v721_v33 }
 0x1a7   :  { %1865 = vpow2.f32 %v799_v27  ;;  %v764_v3 = vsub.f32 %v2270_v10, %v724_v32  ;;  %v98_v27 = vld [vmem:[#allocation5 + $0x8] sm:$0xff]  ;;  %v97_v32 = vld [vmem:[#allocation5] sm:$0xff] }
 0x1a8   :  { %v2352_v35 = vpop.eup %1853  ;;  %1867 = vpow2.f32 %v797_v28  ;;  %v801_v37 = vmul.f32 1.442695, %v763_v7 }
 0x1a9   :  { %v803_v36 = vmul.f32 1.442695, %v764_v3  ;;  %v836_v39 = vsel %vm217_vm0, %v2352_v35, 0.0  ;;  %v2358_v40 = vpop.eup %1855  ;;  %v730_v41 = vpop.xlane.xlu0 %729  ;;  %828 = vadd.xlane.f32.xlu0 %v827_v38 }
 0x1aa   :  { %v766_v10 = vsub.f32 %v2282_v16, %v730_v41  ;;  %837 = vadd.xlane.f32.xlu1 %v836_v39  ;;  %v833_v43 = vsel %vm217_vm0, %v2358_v40, 0.0 }
 0x1ab   :  { %1869 = vpow2.f32 %v803_v36  ;;  %v2406_v36 = vld [vmem:[#allocation5 + $0x78] sm:$0xff] }
 0x1ac   :  { %v2361_v13 = vpop.eup %1857  ;;  %1871 = vpow2.f32 %v801_v37  ;;  %v807_v42 = vmul.f32 1.442695, %v766_v10 }
 0x1ad   :  { %v842_v44 = vsel %vm217_vm0, %v2361_v13, 0.0  ;;  %v2367_v45 = vpop.eup %1859  ;;  %v727_v46 = vpop.xlane.xlu0 %726  ;;  %834 = vadd.xlane.f32.xlu0 %v833_v43 }
 0x1ae   :  { %v765_v47 = vsub.f32 %v2286_v18, %v727_v46  ;;  %843 = vadd.xlane.f32.xlu1 %v842_v44  ;;  %1873 = vpow2.f32 %v807_v42  ;;  %v839_v51 = vsel %vm217_vm0, %v2367_v45, 0.0 }
 0x1b0   :  { %v2370_v16 = vpop.eup %1861  ;;  %v805_v50 = vmul.f32 1.442695, %v765_v47 }
 0x1b1   :  { %v2372_v49 = vpop.eup %1863  ;;  %v854_v52 = vsel %vm217_vm0, %v2370_v16, 0.0  ;;  %840 = vadd.xlane.f32.xlu0 %v839_v51  ;;  %v733_v56 = vpop.xlane.xlu0 %732 }
 0x1b2   :  { %v742_v18 = vpop.xlane.xlu1 %741  ;;  %v767_v57 = vsub.f32 %v2292_v21, %v733_v56  ;;  %855 = vadd.xlane.f32.xlu1 %v854_v52  ;;  %v851_v58 = vsel %vm217_vm0, %v2372_v49, 0.0  ;;  %1875 = vpow2.f32 %v805_v50  ;;  %v101_v21 = vld [vmem:[#allocation5 + $0x20] sm:$0xff]  ;;  %v2437_v52 = vld [vmem:[#allocation5 + $0xb8] sm:$0xff]  ;;  %v2445_v56 = vld [vmem:[#allocation5 + $0xa8] sm:$0xff] }
 0x1b3   :  { %v770_v59 = vsub.f32 %v2294_v22, %v742_v18  ;;  %1740 = vmatprep.subr.mxu1 %v101_v21  ;;  %1790 = vmatprep.subr.mxu0 %v2437_v52  ;;  %v2449_v18 = vld [vmem:[#allocation5 + $0xa0] sm:$0xff] }
 0x1b4   :  { %v2380_v53 = vpop.eup %1865  ;;  %v809_v5 = vmul.f32 1.442695, %v767_v57  ;;  %1741 = vmatpush3.msra.mxu1 %v101_v21  ;;  %1791 = vmatpush3.msra.mxu0 %v2437_v52  ;;  %v2453_v57 = vld [vmem:[#allocation5 + $0x98] sm:$0xff] }
 0x1b5   :  { %v2384_v1 = vpop.eup %1867  ;;  %v815_v6 = vmul.f32 1.442695, %v770_v59  ;;  %v860_v8 = vsel %vm217_vm0, %v2380_v53, 0.0  ;;  %852 = vadd.xlane.f32.xlu0 %v851_v58  ;;  %v736_v22 = vpop.xlane.xlu0 %735  ;;  %1742 = vmatprep.subr.mxu1 %v100_v4  ;;  %v2457_v59 = vld [vmem:[#allocation5 + $0x90] sm:$0xff]  ;;  %v2465_v58 = vld [vmem:[#allocation5 + $0x80] sm:$0xff] }
 0x1b6   :  { %v739_v61 = vpop.xlane.xlu1 %738  ;;  %v768_v9 = vsub.f32 %v2288_v19, %v736_v22  ;;  %861 = vadd.xlane.f32.xlu1 %v860_v8  ;;  %v857_v14 = vsel %vm217_vm0, %v2384_v1, 0.0  ;;  %1743 = vmatpush3.msra.mxu1 %v100_v4  ;;  %v99_v19 = vld [vmem:[#allocation5 + $0x10] sm:$0xff]  ;;  %v122_v22 = vld [vmem:[%s2804_s3 + $0x8] sm:$0xff] }
 0x1b7   :  { %v769_v11 = vsub.f32 %v2300_v25, %v739_v61  ;;  %1877 = vpow2.f32 %v815_v6  ;;  %1744 = vmatprep.subr.mxu1 %v99_v19  ;;  %1792 = vmatprep.subr.mxu0 %v2441_v54  ;;  %vm146_vm1 = vcmp.ne.s32.totalorder %v122_v22, 0  ;;  %v130_v4 = vld [vmem:[%s2804_s3 + $0x48] sm:$0xff] }
 0x1b8   :  { %v2390_v12 = vpop.eup %1869  ;;  %1879 = vpow2.f32 %v809_v5  ;;  %v811_v15 = vmul.f32 1.442695, %v768_v9  ;;  %1745 = vmatpush3.msra.mxu1 %v99_v19  ;;  %1793 = vmatpush3.msra.mxu0 %v2441_v54  ;;  %vm154_vm3 = vcmp.ne.s32.totalorder %v130_v4, 0 }
 0x1b9   :  { %v813_v17 = vmul.f32 1.442695, %v769_v11  ;;  %v866_v20 = vsel %vm217_vm0, %v2390_v12, 0.0  ;;  %v2396_v55 = vpop.eup %1871  ;;  %858 = vadd.xlane.f32.xlu0 %v857_v14  ;;  %1746 = vmatprep.subr.mxu1 %v98_v27  ;;  %v121_v11 = vld [vmem:[%s2804_s3] sm:$0xff] }
 0x1ba   :  { %v745_v25 = vpop.xlane.xlu1 %744  ;;  %867 = vadd.xlane.f32.xlu1 %v866_v20  ;;  %v863_v30 = vsel %vm217_vm0, %v2396_v55, 0.0  ;;  %1747 = vmatpush3.msra.mxu1 %v98_v27  ;;  %vm145_vm2 = vcmp.ne.s32.totalorder %v121_v11, 0  ;;  %v110_v11 = vld [vmem:[#allocation5 + $0x68] sm:$0xff] }
 0x1bb   :  { %v771_v62 = vsub.f32 %v2308_v29, %v745_v25  ;;  %1881 = vpow2.f32 %v813_v17  ;;  %v2401_v33 = vpop.eup %1873  ;;  %1748 = vmatprep.subr.mxu1 %v97_v32  ;;  %1794 = vmatprep.subr.mxu0 %v2445_v56  ;;  %v2029_v17 = vmov 0.0  }
 0x1bc   :  { %1883 = vpow2.f32 %v811_v15  ;;  %1749 = vmatpush3.msra.mxu1 %v97_v32  ;;  %v872_v7 = vsel %vm217_vm0, %v2401_v33, 0.0  ;;  %1795 = vmatpush3.msra.mxu0 %v2445_v56  ;;  %v2479_v20 = vsel %vm146_vm1, 1.0, %v2029_v17 }
 0x1bd   :  { %v817_v28 = vmul.f32 1.442695, %v771_v62  ;;  %864 = vadd.xlane.f32.xlu0 %v863_v30  ;;  %1762 = vmatprep.subr.mxu1 %v2406_v36  ;;  %v129_v62 = vld [vmem:[%s2804_s3 + $0x40] sm:$0xff] }
 0x1be   :  { %v748_v34 = vpop.xlane.xlu1 %747  ;;  %1796 = vmatprep.subr.mxu0 %v2449_v18  ;;  %vm153_vm4 = vcmp.ne.s32.totalorder %v129_v62, 0 }
 0x1bf   :  { %1885 = vpow2.f32 %v817_v28  ;;  %v772_v3 = vsub.f32 %v2302_v26, %v748_v34  ;;  %v2408_v37 = vpop.eup %1875  ;;  %1797 = vmatpush3.msra.mxu0 %v2449_v18  ;;  %v124_v28 = vld [vmem:[%s2804_s3 + $0x18] sm:$0xff]  ;;  %v2490_v34 = vsel %vm145_vm2, 1.0, %v2029_v17 }
 0x1c0   :  { %v869_v39 = vsel %vm217_vm0, %v2408_v37, 0.0  ;;  %1798 = vmatprep.subr.mxu0 %v2453_v57  ;;  %vm148_vm5 = vcmp.ne.s32.totalorder %v124_v28, 0 }
 0x1c1   :  { %v819_v29 = vmul.f32 1.442695, %v772_v3  ;;  %873 = vadd.xlane.f32.xlu0 %v872_v7  ;;  %1799 = vmatpush3.msra.mxu0 %v2453_v57  ;;  %v2493_v3 = vsel %vm154_vm3, 1.0, %v2029_v17 }
 0x1c2   :  { %1800 = vmatprep.subr.mxu0 %v2457_v59 }
 0x1c3   :  { %1887 = vpow2.f32 %v819_v29  ;;  %1801 = vmatpush3.msra.mxu0 %v2457_v59 }
 0x1c4   :  { %v2411_v38 = vpop.eup %1877  ;;  %1802 = vmatprep.subr.mxu0 %v2461_v60 }
 0x1c5   :  { %v2415_v41 = vpop.eup %1879  ;;  %870 = vadd.xlane.f32.xlu0 %v869_v39  ;;  %v884_v26 = vsel %vm217_vm0, %v2411_v38, 0.0  ;;  %1803 = vmatpush3.msra.mxu0 %v2461_v60 }
 0x1c6   :  { %885 = vadd.xlane.f32.xlu1 %v884_v26  ;;  %v875_v42 = vsel %vm217_vm0, %v2415_v41, 0.0  ;;  %1804 = vmatprep.subr.mxu0 %v2465_v58  ;;  %v123_v26 = vld [vmem:[%s2804_s3 + $0x10] sm:$0xff] }
 0x1c7   :  { %1805 = vmatpush3.msra.mxu0 %v2465_v58  ;;  %vm147_vm6 = vcmp.ne.s32.totalorder %v123_v26, 0 }
 0x1c8   :  { %v2419_v10 = vpop.eup %1881 }
 0x1c9   :  { %v2423_v43 = vpop.eup %1883  ;;  %876 = vadd.xlane.f32.xlu0 %v875_v42  ;;  %v881_v44 = vsel %vm217_vm0, %v2419_v10, 0.0 }
 0x1ca   :  { %882 = vadd.xlane.f32.xlu1 %v881_v44  ;;  %v878_v47 = vsel %vm217_vm0, %v2423_v43, 0.0 }
 0x1cc   :  { %v2427_v46 = vpop.eup %1885 }
 0x1cd   :  { %v887_v48 = vsel %vm217_vm0, %v2427_v46, 0.0  ;;  %879 = vadd.xlane.f32.xlu0 %v878_v47  ;;  %v126_v47 = vld [vmem:[%s2804_s3 + $0x28] sm:$0xff] }
 0x1ce   :  { %888 = vadd.xlane.f32.xlu1 %v887_v48  ;;  %vm150_vm7 = vcmp.ne.s32.totalorder %v126_v47, 0 }
 0x1cf   :  { %v2539_v62 = vsel %vm150_vm7, 1.0, %v2029_v17 }
 0x1d0   :  { %v2433_v50 = vpop.eup %1887 }
 0x1d1   :  { %v890_v51 = vsel %vm217_vm0, %v2433_v50, 0.0 }
 0x1d2   :  { %891 = vadd.xlane.f32.xlu1 %v890_v51 }
 0x226   :  { %v826_v5 = vpop.xlane.xlu1 %825 }
 0x227   :  { %1889 = vrcp.f32 %v826_v5  ;;  %v111_v5 = vld [vmem:[#allocation5 + $0x70] sm:$0xff] }
 0x22a   :  { %v823_v6 = vpop.xlane.xlu0 %822  ;;  %v850_v8 = vpop.xlane.xlu1 %849 }
 0x22b   :  { %1891 = vrcp.f32 %v823_v6  ;;  %v2514_v6 = vsel %vm148_vm5, 1.0, %v2029_v17 }
 0x22c   :  { %1893 = vrcp.f32 %v850_v8 }
 0x22e   :  { %v847_v21 = vpop.xlane.xlu0 %846  ;;  %v832_v61 = vpop.xlane.xlu1 %831 }
 0x22f   :  { %1895 = vrcp.f32 %v847_v21 }
 0x230   :  { %1897 = vrcp.f32 %v832_v61  ;;  %v125_v61 = vld [vmem:[%s2804_s3 + $0x20] sm:$0xff] }
 0x231   :  { %vm149_vm8 = vcmp.ne.s32.totalorder %v125_v61, 0 }
 0x232   :  { %v829_v9 = vpop.xlane.xlu0 %828 }
 0x233   :  { %1899 = vrcp.f32 %v829_v9  ;;  %v838_v14 = vpop.xlane.xlu1 %837 }
 0x234   :  { %1901 = vrcp.f32 %v838_v14  ;;  %v1890_v15 = vpop.eup %1889 }
 0x235   :  { %v918_v19 = vmul.f32 %v1890_v15, %v2324_v0 }
 0x236   :  { %v835_v25 = vpop.xlane.xlu0 %834 }
 0x237   :  { %1903 = vrcp.f32 %v835_v25  ;;  %v844_v27 = vpop.xlane.xlu1 %843  ;;  %v942_v32 = vmul.f32 %v2479_v20, %v918_v19  ;;  %v109_v25 = vld [vmem:[#allocation5 + $0x60] sm:$0xff] }
 0x238   :  { %v1892_v30 = vpop.eup %1891  ;;  %1905 = vrcp.f32 %v844_v27 }
 0x239   :  { %v1894_v0 = vpop.eup %1893  ;;  %v917_v29 = vmul.f32 %v1892_v30, %v2332_v2  ;;  %1377 = vst.msk [vmem:[#allocation7 + $0x8] sm:$0xff] %vm217_vm0, %v942_v32 }
 0x23a   :  { %v926_v7 = vmul.f32 %v1894_v0, %v2328_v63  ;;  %v841_v39 = vpop.xlane.xlu0 %840  ;;  %v2509_v63 = vsel %vm153_vm4, 1.0, %v2029_v17  ;;  %v108_v0 = vld [vmem:[#allocation5 + $0x58] sm:$0xff] }
 0x23b   :  { %1907 = vrcp.f32 %v841_v39  ;;  %v856_v42 = vpop.xlane.xlu1 %855  ;;  %v941_v44 = vmul.f32 %v2490_v34, %v917_v29  ;;  %v132_v29 = vld [vmem:[%s2804_s3 + $0x58] sm:$0xff] }
 0x23c   :  { %v1896_v2 = vpop.eup %1895  ;;  %v2506_v48 = vmul.f32 %v2493_v3, %v926_v7  ;;  %1909 = vrcp.f32 %v856_v42  ;;  %vm156_vm11 = vcmp.ne.s32.totalorder %v132_v29, 0 }
 0x23d   :  { %v1898_v51 = vpop.eup %1897  ;;  %1750 = vmatprep.mubr.msk.f32.mxu1 %vm217_vm0, %v941_v44  ;;  %1376 = vst.msk [vmem:[#allocation7] sm:$0xff] %vm217_vm0, %v941_v44  ;;  %v925_v8 = vmul.f32 %v1896_v2, %v2342_v24  ;;  %v128_v24 = vld [vmem:[%s2804_s3 + $0x38] sm:$0xff]  ;;  %v107_v44 = vld [vmem:[#allocation5 + $0x50] sm:$0xff] }
 0x23e   :  { %1385 = vst.msk [vmem:[#allocation7 + $0x48] sm:$0xff] %vm217_vm0, %v2506_v48  ;;  %v853_v21 = vpop.xlane.xlu0 %852  ;;  %1751 = vmatmul.mubr.msk.f32.vlgmr.msra.gmra.mxu1 %vm217_vm0, %v942_v32  ;;  %v920_v22 = vmul.f32 %v1898_v51, %v2338_v23  ;;  %v2533_v23 = vsel %vm147_vm6, 1.0, %v2029_v17  ;;  %vm152_vm9 = vcmp.ne.s32.totalorder %v128_v24, 0  ;;  %v105_v24 = vld [vmem:[#allocation5 + $0x40] sm:$0xff] }
 0x23f   :  { %1911 = vrcp.f32 %v853_v21  ;;  %v862_v9 = vpop.xlane.xlu1 %861  ;;  %1763 = vmatpush3.msra.mxu1 %v2406_v36  ;;  %v2529_v4 = vmul.f32 %v2509_v63, %v925_v8  ;;  %v2562_v47 = vsel %vm152_vm9, 1.0, %v2029_v17  ;;  %v106_v8 = vld [vmem:[#allocation5 + $0x48] sm:$0xff] }
 0x240   :  { %v1900_v14 = vpop.eup %1899  ;;  %1913 = vrcp.f32 %v862_v9  ;;  %1764 = vmatprep.subr.mxu1 %v111_v5  ;;  %v944_v15 = vmul.f32 %v2514_v6, %v920_v22  ;;  %v134_v21 = vld [vmem:[%s2804_s3 + $0x68] sm:$0xff] }
 0x241   :  { %v1902_v19 = vpop.eup %1901  ;;  %v919_v36 = vmul.f32 %v1900_v14, %v2346_v31  ;;  %1765 = vmatpush3.msra.mxu1 %v111_v5  ;;  %1384 = vst.msk [vmem:[#allocation7 + $0x40] sm:$0xff] %vm217_vm0, %v2529_v4  ;;  %v127_v31 = vld [vmem:[%s2804_s3 + $0x30] sm:$0xff]  ;;  %v2584_v14 = vsel %vm156_vm11, 1.0, %v2029_v17  ;;  %vm158_vm13 = vcmp.ne.s32.totalorder %v134_v21, 0 }
 0x242   :  { %v859_v27 = vpop.xlane.xlu0 %858  ;;  %1379 = vst.msk [vmem:[#allocation7 + $0x18] sm:$0xff] %vm217_vm0, %v944_v15  ;;  %1766 = vmatprep.subr.mxu1 %v110_v11  ;;  %v922_v28 = vmul.f32 %v1902_v19, %v2352_v35  ;;  %v2554_v35 = vsel %vm149_vm8, 1.0, %v2029_v17  ;;  %vm151_vm10 = vcmp.ne.s32.totalorder %v127_v31, 0  ;;  %v131_v5 = vld [vmem:[%s2804_s3 + $0x50] sm:$0xff] }
 0x243   :  { %1915 = vrcp.f32 %v859_v27  ;;  %v868_v30 = vpop.xlane.xlu1 %867  ;;  %v943_v32 = vmul.f32 %v2533_v23, %v919_v36  ;;  %1767 = vmatpush3.msra.mxu1 %v110_v11  ;;  %v2576_v61 = vsel %vm151_vm10, 1.0, %v2029_v17  ;;  %vm155_vm12 = vcmp.ne.s32.totalorder %v131_v5, 0  ;;  %v133_v36 = vld [vmem:[%s2804_s3 + $0x60] sm:$0xff] }
 0x244   :  { %v1904_v7 = vpop.eup %1903  ;;  %1917 = vrcp.f32 %v868_v30  ;;  %1768 = vmatprep.subr.mxu1 %v109_v25  ;;  %v946_v39 = vmul.f32 %v2539_v62, %v922_v28  ;;  %v2597_v28 = vsel %vm155_vm12, 1.0, %v2029_v17  ;;  %vm157_vm14 = vcmp.ne.s32.totalorder %v133_v36, 0 }
 0x245   :  { %v1906_v26 = vpop.eup %1905  ;;  %1753 = vmatprep.mubr.msk.f32.mxu1 %vm217_vm0, %v943_v32  ;;  %1378 = vst.msk [vmem:[#allocation7 + $0x10] sm:$0xff] %vm217_vm0, %v943_v32  ;;  %v921_v42 = vmul.f32 %v1904_v7, %v2358_v40  ;;  %1769 = vmatpush3.msra.mxu1 %v109_v25  ;;  %v136_v25 = vld [vmem:[%s2804_s3 + $0x78] sm:$0xff]  ;;  %v2604_v32 = vsel %vm158_vm13, 1.0, %v2029_v17  ;;  %v135_v7 = vld [vmem:[%s2804_s3 + $0x70] sm:$0xff] }
 0x246   :  { %v865_v2 = vpop.xlane.xlu0 %864  ;;  %1754 = vmatmul.mubr.msk.f32.gmra.mxu1 %vm217_vm0, %v944_v15  ;;  %1381 = vst.msk [vmem:[#allocation7 + $0x28] sm:$0xff] %vm217_vm0, %v946_v39  ;;  %1770 = vmatprep.subr.mxu1 %v108_v0  ;;  %v924_v51 = vmul.f32 %v1906_v26, %v2361_v13  ;;  %vm160_vm15 = vcmp.ne.s32.totalorder %v136_v25, 0  ;;  %vm159_vm1 = vcmp.ne.s32.totalorder %v135_v7, 0 }
 0x247   :  { %1919 = vrcp.f32 %v865_v2  ;;  %v945_v40 = vmul.f32 %v2554_v35, %v921_v42  ;;  %1771 = vmatpush3.msra.mxu1 %v108_v0  ;;  %v2617_v42 = vsel %vm157_vm14, 1.0, %v2029_v17 }
 0x248   :  { %v1908_v22 = vpop.eup %1907  ;;  %1772 = vmatprep.subr.mxu1 %v107_v44  ;;  %v948_v13 = vmul.f32 %v2562_v47, %v924_v51  ;;  %v2623_v51 = vsel %vm160_vm15, 1.0, %v2029_v17 }
 0x249   :  { %v1910_v9 = vpop.eup %1909  ;;  %1756 = vmatprep.mubr.msk.f32.mxu1 %vm217_vm0, %v945_v40  ;;  %1380 = vst.msk [vmem:[#allocation7 + $0x20] sm:$0xff] %vm217_vm0, %v945_v40  ;;  %v923_v11 = vmul.f32 %v1908_v22, %v2367_v45  ;;  %1773 = vmatpush3.msra.mxu1 %v107_v44  ;;  %v2637_v22 = vsel %vm159_vm1, 1.0, %v2029_v17 }
 0x24a   :  { %v874_v15 = vpop.xlane.xlu0 %873  ;;  %1757 = vmatmul.mubr.msk.f32.gmra.mxu1 %vm217_vm0, %v946_v39  ;;  %1383 = vst.msk [vmem:[#allocation7 + $0x38] sm:$0xff] %vm217_vm0, %v948_v13  ;;  %1774 = vmatprep.subr.mxu1 %v106_v8  ;;  %v928_v19 = vmul.f32 %v1910_v9, %v2370_v16  ;;  %v142_v9 = vld [vmem:[%s2804_s3 + $0xa8] sm:$0xff] }
 0x24b   :  { %1921 = vrcp.f32 %v874_v15  ;;  %v947_v45 = vmul.f32 %v2576_v61, %v923_v11  ;;  %1775 = vmatpush3.msra.mxu1 %v106_v8  ;;  %vm166_vm4 = vcmp.ne.s32.totalorder %v142_v9, 0 }
 0x24c   :  { %v1912_v27 = vpop.eup %1911  ;;  %1776 = vmatprep.subr.mxu1 %v105_v24  ;;  %v952_v16 = vmul.f32 %v2584_v14, %v928_v19 }
 0x24d   :  { %v1914_v31 = vpop.eup %1913  ;;  %1759 = vmatprep.mubr.msk.f32.mxu1 %vm217_vm0, %v947_v45  ;;  %1382 = vst.msk [vmem:[#allocation7 + $0x30] sm:$0xff] %vm217_vm0, %v947_v45  ;;  %1777 = vmatpush3.msra.mxu1 %v105_v24  ;;  %v927_v30 = vmul.f32 %v1912_v27, %v2372_v49  ;;  %v2680_v27 = vsel %vm166_vm4, 1.0, %v2029_v17 }
 0x24e   :  { %v871_v0 = vpop.xlane.xlu0 %870  ;;  %1760 = vmatmul.mubr.msk.f32.gmra.mxu1 %vm217_vm0, %v948_v13  ;;  %1387 = vst.msk [vmem:[#allocation7 + $0x58] sm:$0xff] %vm217_vm0, %v952_v16  ;;  %1818 = vmatprep.subr.mxu1 %v2437_v52  ;;  %v930_v29 = vmul.f32 %v1914_v31, %v2380_v53  ;;  %v140_v31 = vld [vmem:[%s2804_s3 + $0x98] sm:$0xff] }
 0x24f   :  { %1923 = vrcp.f32 %v871_v0  ;;  %v886_v49 = vpop.xlane.xlu1 %885  ;;  %1778 = vmatprep.mubr.msk.f32.mxu1 %vm217_vm0, %v2529_v4  ;;  %v951_v39 = vmul.f32 %v2597_v28, %v927_v30  ;;  %v138_v4 = vld [vmem:[%s2804_s3 + $0x88] sm:$0xff]  ;;  %vm164_vm7 = vcmp.ne.s32.totalorder %v140_v31, 0 }
 0x250   :  { %v1916_v26 = vpop.eup %1915  ;;  %1925 = vrcp.f32 %v886_v49  ;;  %v954_v44 = vmul.f32 %v2604_v32, %v930_v29  ;;  %vm162_vm2 = vcmp.ne.s32.totalorder %v138_v4, 0 }
 0x251   :  { %v1918_v53 = vpop.eup %1917  ;;  %1386 = vst.msk [vmem:[#allocation7 + $0x50] sm:$0xff] %vm217_vm0, %v951_v39  ;;  %v929_v2 = vmul.f32 %v1916_v26, %v2384_v1  ;;  %v2657_v24 = vsel %vm162_vm2, 1.0, %v2029_v17  ;;  %v144_v26 = vld [vmem:[%s2804_s3 + $0xb8] sm:$0xff] }
 0x252   :  { %v877_v5 = vpop.xlane.xlu0 %876  ;;  %1779 = vmatmul.mubr.msk.f32.vlgmr.msra.gmra.mxu1 %vm217_vm0, %v2506_v48  ;;  %1389 = vst.msk [vmem:[#allocation7 + $0x68] sm:$0xff] %vm217_vm0, %v954_v44  ;;  %v932_v40 = vmul.f32 %v1918_v53, %v2390_v12  ;;  %vm168_vm9 = vcmp.ne.s32.totalorder %v144_v26, 0 }
 0x253   :  { %1927 = vrcp.f32 %v877_v5  ;;  %v883_v8 = vpop.xlane.xlu1 %882  ;;  %1781 = vmatprep.mubr.msk.f32.mxu1 %vm217_vm0, %v951_v39  ;;  %v953_v1 = vmul.f32 %v2617_v42, %v929_v2  ;;  %1826 = vmatpush3.msra.mxu1 %v2437_v52  ;;  %v137_v52 = vld [vmem:[%s2804_s3 + $0x80] sm:$0xff] }
 0x254   :  { %v1920_v21 = vpop.eup %1919  ;;  %1929 = vrcp.f32 %v883_v8  ;;  %1819 = vmatprep.subr.mxu1 %v2441_v54  ;;  %v956_v48 = vmul.f32 %v2623_v51, %v932_v40  ;;  %vm161_vm3 = vcmp.ne.s32.totalorder %v137_v52, 0 }
 0x255   :  { %1388 = vst.msk [vmem:[#allocation7 + $0x60] sm:$0xff] %vm217_vm0, %v953_v1  ;;  %1827 = vmatpush3.msra.mxu1 %v2441_v54  ;;  %v931_v12 = vmul.f32 %v1920_v21, %v2396_v55  ;;  %v2676_v45 = vsel %vm161_vm3, 1.0, %v2029_v17 }
 0x256   :  { %v880_v13 = vpop.xlane.xlu0 %879  ;;  %1782 = vmatmul.mubr.msk.f32.gmra.mxu1 %vm217_vm0, %v952_v16  ;;  %1820 = vmatprep.subr.mxu1 %v2445_v56  ;;  %1391 = vst.msk [vmem:[#allocation7 + $0x78] sm:$0xff] %vm217_vm0, %v956_v48 }
 0x257   :  { %1931 = vrcp.f32 %v880_v13  ;;  %v889_v11 = vpop.xlane.xlu1 %888  ;;  %1784 = vmatprep.mubr.msk.f32.mxu1 %vm217_vm0, %v953_v1  ;;  %v955_v55 = vmul.f32 %v2637_v22, %v931_v12  ;;  %1828 = vmatpush3.msra.mxu1 %v2445_v56  ;;  %v139_v56 = vld [vmem:[%s2804_s3 + $0x90] sm:$0xff] }
 0x258   :  { %v1922_v54 = vpop.eup %1921  ;;  %1933 = vrcp.f32 %v889_v11  ;;  %1821 = vmatprep.subr.mxu1 %v2449_v18  ;;  %vm163_vm5 = vcmp.ne.s32.totalorder %v139_v56, 0 }
 0x259   :  { %v934_v15 = vmul.f32 %v1922_v54, %v2401_v33  ;;  %1390 = vst.msk [vmem:[#allocation7 + $0x70] sm:$0xff] %vm217_vm0, %v955_v55  ;;  %1829 = vmatpush3.msra.mxu1 %v2449_v18  ;;  %v141_v33 = vld [vmem:[%s2804_s3 + $0xa0] sm:$0xff]  ;;  %v2698_v0 = vsel %vm163_vm5, 1.0, %v2029_v17 }
 0x25a   :  { %1785 = vmatmul.mubr.msk.f32.gmra.mxu1 %vm217_vm0, %v954_v44  ;;  %1822 = vmatprep.subr.mxu1 %v2453_v57  ;;  %vm165_vm6 = vcmp.ne.s32.totalorder %v141_v33, 0  ;;  %v2716_v44 = vsel %vm164_vm7, 1.0, %v2029_v17 }
 0x25b   :  { %v958_v19 = vmul.f32 %v2657_v24, %v934_v15  ;;  %v892_v36 = vpop.xlane.xlu1 %891  ;;  %1787 = vmatprep.mubr.msk.f32.mxu1 %vm217_vm0, %v955_v55  ;;  %1830 = vmatpush3.msra.mxu1 %v2453_v57  ;;  %v2705_v7 = vsel %vm165_vm6, 1.0, %v2029_v17 }
 0x25c   :  { %v1924_v18 = vpop.eup %1923  ;;  %1935 = vrcp.f32 %v892_v36  ;;  %1823 = vmatprep.subr.mxu1 %v2457_v59 }
 0x25d   :  { %v1926_v25 = vpop.eup %1925  ;;  %1393 = vst.msk [vmem:[#allocation7 + $0x88] sm:$0xff] %vm217_vm0, %v958_v19  ;;  %1831 = vmatpush3.msra.mxu1 %v2457_v59  ;;  %v933_v57 = vmul.f32 %v1924_v18, %v2408_v37  ;;  %v143_v37 = vld [vmem:[%s2804_s3 + $0xb0] sm:$0xff]  ;;  %s2030_s3 = smov [#allocation7]  }
 0x25e   :  { %v938_v16 = vmul.f32 %v1926_v25, %v2411_v38  ;;  %1788 = vmatmul.mubr.msk.f32.gmra.mxu1 %vm217_vm0, %v956_v48  ;;  %1824 = vmatprep.subr.mxu1 %v2461_v60  ;;  %vm167_vm8 = vcmp.ne.s32.totalorder %v143_v37, 0  ;;  %s1429_s24 = sshll.u32 %s2030_s3, 4  ;;  %s1430_s24 = int_to_ptr.vmem [resolvable:$true] %s1429_s24 }
 0x25f   :  { %v957_v30 = vmul.f32 %v2676_v45, %v933_v57  ;;  %1832 = vmatpush3.msra.mxu1 %v2461_v60  ;;  %v2722_v2 = vsel %vm167_vm8, 1.0, %v2029_v17  ;;  %s1977_s25 = scalar_lea.vmem %s1430_s24, 3072  ;;  %p1982_p11 = scmp.lt.s32.totalorder %s1430_s24, %s1430_s24 }
 0x260   :  { %v1928_v59 = vpop.eup %1927  ;;  %v962_v38 = vmul.f32 %v2680_v27, %v938_v16  ;;  %1825 = vmatprep.subr.mxu1 %v2465_v58  ;;  %p1978_p10 = scmp.ne.s32.totalorder %s1430_s24, %s1977_s25  ;;  %p1983_p12 = scmp.lt.s32.totalorder %s1977_s25, %s1977_s25 }
 0x261   :  { %v1930_v29 = vpop.eup %1929  ;;  %1806 = vmatprep.mubr.msk.f32.mxu0 %vm217_vm0, %v957_v30  ;;  %1392 = vst.msk [vmem:[#allocation7 + $0x80] sm:$0xff] %vm217_vm0, %v957_v30  ;;  %1833 = vmatpush3.msra.mxu1 %v2465_v58  ;;  %v935_v60 = vmul.f32 %v1928_v59, %v2415_v41 }
 0x262   :  { %1397 = vst.msk [vmem:[#allocation7 + $0xa8] sm:$0xff] %vm217_vm0, %v962_v38  ;;  %1807 = vmatmul.mubr.msk.f32.vlgmr.msra.gmra.mxu0 %vm217_vm0, %v958_v19  ;;  %v937_v49 = vmul.f32 %v1930_v29, %v2419_v10  ;;  %p1984_p13 = por %p1983_p12, %p1982_p11 }
 0x263   :  { %v959_v39 = vmul.f32 %v2698_v0, %v935_v60 }
 0x264   :  { %v1932_v58 = vpop.eup %1931  ;;  %v961_v41 = vmul.f32 %v2705_v7, %v937_v49  ;;  %p1985_p0 = pnand %p1984_p13, %p1978_p10 }
 0x265   :  { %v1934_v53 = vpop.eup %1933  ;;  %1809 = vmatprep.mubr.msk.f32.mxu0 %vm217_vm0, %v959_v39  ;;  %1394 = vst.msk [vmem:[#allocation7 + $0x90] sm:$0xff] %vm217_vm0, %v959_v39  ;;  %v936_v10 = vmul.f32 %v1932_v58, %v2423_v43  ;;  %v2733_v43 = vsel %vm168_vm9, 1.0, %v2029_v17 }
 0x266   :  { %1812 = vmatprep.mubr.msk.f32.mxu1 %vm217_vm0, %v961_v41  ;;  %1396 = vst.msk [vmem:[#allocation7 + $0xa0] sm:$0xff] %vm217_vm0, %v961_v41  ;;  %v939_v4 = vmul.f32 %v1934_v53, %v2427_v46 }
 0x267   :  { %1813 = vmatmul.mubr.msk.f32.vlgmr.msra.gmra.mxu1 %vm217_vm0, %v962_v38  ;;  %v960_v5 = vmul.f32 %v2716_v44, %v936_v10 }
 0x268   :  { %v963_v40 = vmul.f32 %v2722_v2, %v939_v4 }
 0x269   :  { %v1936_v8 = vpop.eup %1935  ;;  %1810 = vmatmul.mubr.msk.f32.gmra.mxu0 %vm217_vm0, %v960_v5  ;;  %1395 = vst.msk [vmem:[#allocation7 + $0x98] sm:$0xff] %vm217_vm0, %v960_v5 }
 0x26a   :  { %1815 = vmatprep.mubr.msk.f32.mxu1 %vm217_vm0, %v963_v40  ;;  %1398 = vst.msk [vmem:[#allocation7 + $0xb0] sm:$0xff] %vm217_vm0, %v963_v40  ;;  %v940_v46 = vmul.f32 %v1936_v8, %v2433_v50 }
 0x26c   :  { %v964_v1 = vmul.f32 %v2733_v43, %v940_v46 }
 0x26e   :  { %1816 = vmatmul.mubr.msk.f32.gmra.mxu1 %vm217_vm0, %v964_v1  ;;  %1399 = vst.msk [vmem:[#allocation7 + $0xb8] sm:$0xff] %vm217_vm0, %v964_v1 }
 0x26f   :  { %1988 = shalt.err (!%p1985_p0)
}
 0x270   :  { %1435 = dma.vmem_to_hbm [thread:$0]  %s1430_s24, 3072, %s2805_s4, [#allocation4], %s2026_s21, %s2026_s21, %s2027_s22  }
 0x271   :  { %s2031_s4 = smov [#allocation8]  }
 0x272   :  { %s1441_s0 = sshll.u32 %s2031_s4, 4  ;;  %s1442_s0 = int_to_ptr.vmem [resolvable:$true] %s1441_s0 }
 0x273   :  { %s1997_s28 = scalar_lea.vmem %s1442_s0, 3072  ;;  %p2002_p2 = scmp.lt.s32.totalorder %s1442_s0, %s1442_s0 }
 0x274   :  { %p1998_p1 = scmp.ne.s32.totalorder %s1442_s0, %s1997_s28  ;;  %p2003_p3 = scmp.lt.s32.totalorder %s1997_s28, %s1997_s28 }
 0x276   :  { %p2004_p4 = por %p2003_p3, %p2002_p2 }
 0x278   :  { %p2005_p5 = pnand %p2004_p4, %p1998_p1 }
 0x2fe   :  { %v1752_v50 = vpop.f32.mrf.mxu1 }
 0x2ff   :  { %v1353_v17 = vmul.f32 %v1752_v50, %v2479_v20 }
 0x300   :  { %v1055_v21 = vpop.f32.mrf.mxu1 }
 0x301   :  { %1401 = vst.msk [vmem:[#allocation8 + $0x8] sm:$0xff] %vm217_vm0, %v1353_v17  ;;  %v1352_v48 = vmul.f32 %v2490_v34, %v1055_v21 }
 0x303   :  { %1400 = vst.msk [vmem:[#allocation8] sm:$0xff] %vm217_vm0, %v1352_v48 }
 0x306   :  { %v1755_v12 = vpop.f32.mrf.mxu1 }
 0x307   :  { %v1355_v13 = vmul.f32 %v1755_v12, %v2514_v6 }
 0x308   :  { %v1065_v52 = vpop.f32.mrf.mxu1 }
 0x309   :  { %1403 = vst.msk [vmem:[#allocation8 + $0x18] sm:$0xff] %vm217_vm0, %v1355_v13  ;;  %v1354_v9 = vmul.f32 %v2533_v23, %v1065_v52 }
 0x30a   :  { %v1758_v11 = vpop.f32.mrf.mxu1 }
 0x30b   :  { %1402 = vst.msk [vmem:[#allocation8 + $0x10] sm:$0xff] %vm217_vm0, %v1354_v9  ;;  %v1357_v20 = vmul.f32 %v1758_v11, %v2539_v62 }
 0x30c   :  { %v1075_v55 = vpop.f32.mrf.mxu1 }
 0x30d   :  { %1405 = vst.msk [vmem:[#allocation8 + $0x28] sm:$0xff] %vm217_vm0, %v1357_v20  ;;  %v1356_v34 = vmul.f32 %v2554_v35, %v1075_v55 }
 0x30e   :  { %v1761_v54 = vpop.f32.mrf.mxu1 }
 0x30f   :  { %1404 = vst.msk [vmem:[#allocation8 + $0x20] sm:$0xff] %vm217_vm0, %v1356_v34  ;;  %v1359_v6 = vmul.f32 %v1761_v54, %v2562_v47 }
 0x310   :  { %v1085_v15 = vpop.f32.mrf.mxu1 }
 0x311   :  { %1407 = vst.msk [vmem:[#allocation8 + $0x38] sm:$0xff] %vm217_vm0, %v1359_v6  ;;  %v1358_v23 = vmul.f32 %v2576_v61, %v1085_v15 }
 0x312   :  { %v1780_v56 = vpop.f32.mrf.mxu1 }
 0x313   :  { %1406 = vst.msk [vmem:[#allocation8 + $0x30] sm:$0xff] %vm217_vm0, %v1358_v23  ;;  %v1361_v62 = vmul.f32 %v1780_v56, %v2493_v3 }
 0x314   :  { %v1184_v19 = vpop.f32.mrf.mxu1 }
 0x315   :  { %1409 = vst.msk [vmem:[#allocation8 + $0x48] sm:$0xff] %vm217_vm0, %v1361_v62  ;;  %v1360_v35 = vmul.f32 %v2509_v63, %v1184_v19 }
 0x316   :  { %v1783_v36 = vpop.f32.mrf.mxu1 }
 0x317   :  { %1408 = vst.msk [vmem:[#allocation8 + $0x40] sm:$0xff] %vm217_vm0, %v1360_v35  ;;  %v1363_v47 = vmul.f32 %v1783_v36, %v2584_v14 }
 0x318   :  { %v1194_v33 = vpop.f32.mrf.mxu1 }
 0x319   :  { %1411 = vst.msk [vmem:[#allocation8 + $0x58] sm:$0xff] %vm217_vm0, %v1363_v47  ;;  %v1362_v61 = vmul.f32 %v2597_v28, %v1194_v33 }
 0x31a   :  { %v1786_v18 = vpop.f32.mrf.mxu1 }
 0x31b   :  { %1410 = vst.msk [vmem:[#allocation8 + $0x50] sm:$0xff] %vm217_vm0, %v1362_v61  ;;  %v1365_v3 = vmul.f32 %v1786_v18, %v2604_v32 }
 0x31c   :  { %v1204_v25 = vpop.f32.mrf.mxu1 }
 0x31d   :  { %1413 = vst.msk [vmem:[#allocation8 + $0x68] sm:$0xff] %vm217_vm0, %v1365_v3  ;;  %v1364_v63 = vmul.f32 %v2617_v42, %v1204_v25 }
 0x31e   :  { %v1789_v57 = vpop.f32.mrf.mxu1 }
 0x31f   :  { %1412 = vst.msk [vmem:[#allocation8 + $0x60] sm:$0xff] %vm217_vm0, %v1364_v63  ;;  %v1367_v14 = vmul.f32 %v1789_v57, %v2623_v51 }
 0x320   :  { %v1214_v16 = vpop.f32.mrf.mxu1 }
 0x321   :  { %1415 = vst.msk [vmem:[#allocation8 + $0x78] sm:$0xff] %vm217_vm0, %v1367_v14  ;;  %v1366_v28 = vmul.f32 %v2637_v22, %v1214_v16 }
 0x322   :  { %v1808_v31 = vpop.f32.mrf.mxu0 }
 0x323   :  { %1414 = vst.msk [vmem:[#allocation8 + $0x70] sm:$0xff] %vm217_vm0, %v1366_v28  ;;  %v1369_v32 = vmul.f32 %v1808_v31, %v2657_v24 }
 0x324   :  { %v1313_v30 = vpop.f32.mrf.mxu0 }
 0x325   :  { %1417 = vst.msk [vmem:[#allocation8 + $0x88] sm:$0xff] %vm217_vm0, %v1369_v32  ;;  %v1368_v42 = vmul.f32 %v2676_v45, %v1313_v30 }
 0x327   :  { %1416 = vst.msk [vmem:[#allocation8 + $0x80] sm:$0xff] %vm217_vm0, %v1368_v42  ;;  %v1814_v37 = vpop.f32.mrf.mxu1 }
 0x328   :  { %v1373_v51 = vmul.f32 %v1814_v37, %v2680_v27 }
 0x329   :  { %v1333_v59 = vpop.f32.mrf.mxu1  ;;  %v1811_v38 = vpop.f32.mrf.mxu0 }
 0x32a   :  { %1421 = vst.msk [vmem:[#allocation8 + $0xa8] sm:$0xff] %vm217_vm0, %v1373_v51  ;;  %v1372_v22 = vmul.f32 %v2705_v7, %v1333_v59  ;;  %v1371_v29 = vmul.f32 %v1811_v38, %v2716_v44 }
 0x32b   :  { %v1323_v60 = vpop.f32.mrf.mxu0 }
 0x32c   :  { %1420 = vst.msk [vmem:[#allocation8 + $0xa0] sm:$0xff] %vm217_vm0, %v1372_v22  ;;  %1419 = vst.msk [vmem:[#allocation8 + $0x98] sm:$0xff] %vm217_vm0, %v1371_v29  ;;  %v1370_v24 = vmul.f32 %v2698_v0, %v1323_v60 }
 0x32e   :  { %1418 = vst.msk [vmem:[#allocation8 + $0x90] sm:$0xff] %vm217_vm0, %v1370_v24  ;;  %v1817_v45 = vpop.f32.mrf.mxu1 }
 0x32f   :  { %v1375_v27 = vmul.f32 %v1817_v45, %v2733_v43 }
 0x330   :  { %v1343_v49 = vpop.f32.mrf.mxu1 }
 0x331   :  { %1423 = vst.msk [vmem:[#allocation8 + $0xb8] sm:$0xff] %vm217_vm0, %v1375_v27  ;;  %v1374_v7 = vmul.f32 %v2722_v2, %v1343_v49 }
 0x333   :  { %1422 = vst.msk [vmem:[#allocation8 + $0xb0] sm:$0xff] %vm217_vm0, %v1374_v7 }
 0x334   :  { %2008 = shalt.err (!%p2005_p5)
}
 0x335   :  { %1447 = dma.vmem_to_hbm [thread:$0]  %s1442_s0, 3072, %s2806_s5, [#allocation9], %s2026_s21, %s2026_s21, %s2027_s22  }
 0x336   :  { %2021 = dma.done.wait [#allocation4], 3072  }
 0x337   :  { %2022 = vsyncadd [#allocation4], 4294964224 }
 0x338   :  { %2023 = dma.done.wait [#allocation9], 3072  }
 0x339   :  { %2024 = vsyncadd [#allocation9], 4294964224 }
 0x33a   :  { %1454 = vsyncpa [#allocation3], 1 }
 0x33b   :  { %1455 = vsyncpa [#allocation6], 1 }
 0x33c   :  { %1456 = vsyncpa [#allocation4], 1 }
 0x33d   :  { %1457 = vsyncpa [#allocation9], 1 }

</bundles_post_ra>
